<compile_context>
chip_gen: v7x
topology: tpu7x:2x2x1
jax: 0.10.0
libtpu: 0.0.40
codegen_flags: <defaults>
</compile_context>

<pallas_src>
import functools

import numpy as np
import jax
import jax.numpy as jnp
from jax.experimental import pallas as pl
from jax.experimental.pallas import tpu as pltpu

_EPS = 1e-5  # BatchNorm2d default eps


# --------------------------------------------------------------------------
# Wrapper-side weight repacking (runs under XLA, outside the kernel).
# --------------------------------------------------------------------------
def _toeplitz(wk, w):
    """HWIO conv weight (3,3,cI,cO) -> K-stacked Toeplitz matrix (3*cI*w, cO*w).

    Block kh of the K axis satisfies
      M[kh][ci*w + wi, co*w + wo] = wk[kh, wi-wo+1, ci, co]  if wi-wo+1 in {0,1,2}
                                  = 0                         otherwise
    so a 3x3 SAME conv is  out = [row(ho-1) | row(ho) | row(ho+1)] @ M ;
    the W-boundary zero padding is implicit (missing taps have no entry).
    """
    wk = wk.astype(jnp.float32)
    _, _, c_in, c_out = wk.shape
    wi = jnp.arange(w)[:, None]
    wo = jnp.arange(w)[None, :]
    kw = wi - wo + 1                                   # (w, w)
    valid = (kw >= 0) & (kw <= 2)
    t = wk[:, jnp.clip(kw, 0, 2), :, :]                # (3, w, w, cI, cO)
    t = jnp.where(valid[None, :, :, None, None], t, 0.0)
    t = jnp.transpose(t, (0, 3, 1, 4, 2))              # (3, cI, wi, cO, wo)
    return t.reshape(3 * c_in * w, c_out * w)          # kh-major K stacking


# --------------------------------------------------------------------------
# Kernel
# --------------------------------------------------------------------------
def _convblock_kernel(xpatch_ref, m1_ref, m2_ref, vec_ref, g_ref, ssel_ref,
                      skip_ref, pool_ref, *, h):
    rows = xpatch_ref.shape[0]           # N*H
    l_out = m1_ref.shape[-1]             # cout*W

    def bn_relu(y, gamma, beta):
        # Training-mode BatchNorm2d (batch stats, biased var) + ReLU, all f32.
        # [sum; sum_sq] stacked -> one small matmul broadcasts channel means.
        s = jnp.concatenate([jnp.sum(y, axis=0, keepdims=True),
                             jnp.sum(y * y, axis=0, keepdims=True)], axis=0)
        st = jnp.dot(s, g_ref[...], preferred_element_type=jnp.float32)  # (2, l_out)
        mean = st[0:1, :]
        var = st[1:2, :] - mean * mean
        scale = gamma * jax.lax.rsqrt(var + _EPS)      # EUP rsqrt
        shift = beta - mean * scale
        return jnp.maximum(y * scale + shift, 0.0)

    # ---- conv1: single deep-K (3*cin*W) bf16 matmul on the wrapper-built
    #      shifted-row patch.  Conv bias dropped (cancels under training BN).
    y = bn_relu(jnp.dot(xpatch_ref[...], m1_ref[...],
                        preferred_element_type=jnp.float32),
                vec_ref[0:1, :], vec_ref[1:2, :])

    # ---- conv2: shifted rows built in-kernel with XLU rolls + per-image
    #      boundary masks; one deep-K (3*cout*W) bf16 matmul.  No scratch.
    hr = jax.lax.broadcasted_iota(jnp.int32, (rows, l_out), 0) % h
    prev = jnp.where(hr == 0, 0.0,
                     pltpu.roll(y, 1, axis=0)).astype(jnp.bfloat16)
    nxt = jnp.where(hr == h - 1, 0.0,
                    pltpu.roll(y, rows - 1, axis=0)).astype(jnp.bfloat16)
    patch2 = jnp.concatenate([prev, y.astype(jnp.bfloat16), nxt], axis=-1)
    y2 = bn_relu(jnp.dot(patch2, m2_ref[...],
                         preferred_element_type=jnp.float32),
                 vec_ref[2:3, :], vec_ref[3:4, :])

    skip_ref[...] = y2                                 # full-tile store

    # ---- MaxPool2d(2,2):
    #   H pairs: pure VPU max over sublane pairs (no selection matmul).
    #   W pairs: two tiny 0/1-selection matmuls that also compact the lanes
    #            and pad the output to a full 128-lane unmasked store.
    y2p = y2.reshape(rows // 2, 2, l_out)
    yh = jnp.maximum(y2p[:, 0, :], y2p[:, 1, :])       # (rows//2, l_out)
    pool_ref[...] = jnp.maximum(
        jnp.dot(yh, ssel_ref[0], preferred_element_type=jnp.float32),
        jnp.dot(yh, ssel_ref[1], preferred_element_type=jnp.float32))


def _full_spec(shape):
    nd = len(shape)
    return pl.BlockSpec(shape, lambda i, _nd=nd: (0,) * _nd)


# --------------------------------------------------------------------------
# Public wrapper: NCHW in / NCHW out (matches the PyTorch module).
# --------------------------------------------------------------------------
def conv_block_forward(x_nchw, params, pool=True):
    """Pallas ConvBlock.forward.  Returns (out, skip_x), both NCHW."""
    x = x_nchw.astype(jnp.float32)
    n, cin, h, w = x.shape
    cout = params["w1"].shape[-1]
    assert h % 2 == 0 and w % 2 == 0, "MaxPool2d(2,2) needs even H and W"
    l1, l2 = cin * w, cout * w
    rows = n * h

    # Channel-major lane layout (N*H, cin*W) and wrapper-built shifted-row
    # patch for conv1: columns = [row(h-1) | row(h) | row(h+1)], bf16.
    xh = jnp.transpose(x, (0, 2, 1, 3)).reshape(n, h, l1)
    xprev = jnp.pad(xh[:, :-1, :], ((0, 0), (1, 0), (0, 0)))
    xnext = jnp.pad(xh[:, 1:, :], ((0, 0), (0, 1), (0, 0)))
    xpatch = jnp.concatenate([xprev, xh, xnext], axis=-1) \
                .reshape(rows, 3 * l1).astype(jnp.bfloat16)

    # K-stacked block-Toeplitz conv weights, bf16 for the MXU.
    m1 = _toeplitz(params["w1"], w).astype(jnp.bfloat16)      # (3*cin*W, cout*W)
    m2 = _toeplitz(params["w2"], w).astype(jnp.bfloat16)      # (3*cout*W, cout*W)

    # BN affine params repeated across the W lanes of each channel (f32).
    # Conv biases b1/b2 are intentionally NOT passed: they cancel under
    # training-mode BatchNorm.
    rep = lambda name: jnp.repeat(params[name].astype(jnp.float32), w)
    vecs = jnp.stack([rep("g1"), rep("beta1"), rep("g2"), rep("beta2")])  # (4, l2)

    # Per-channel mean matrix: (stats @ G) broadcasts channel means to lanes.
    ch = jnp.arange(l2) // w
    gmat = (ch[:, None] == ch[None, :]).astype(jnp.float32) / float(n * h * w)

    # W-direction 2x2-maxpool 0/1 selectors; output dim padded to a multiple
    # of 128 so the pooled store is a full-width unmasked vst.
    lp = cout * (w // 2)
    wp = ((lp + 127) // 128) * 128
    li = jnp.arange(l2)
    lo = jnp.arange(wp)
    tgt = (li // w) * (w // 2) + (li % w) // 2
    hit = lo[None, :] == tgt[:, None]                   # (l2, wp); cols >= lp never hit
    even = ((li % w) % 2 == 0)[:, None]
    ssel = jnp.stack([jnp.where(even & hit, 1.0, 0.0),
                      jnp.where((~even) & hit, 1.0, 0.0)]).astype(jnp.float32)

    out_shapes = (jax.ShapeDtypeStruct((rows, l2), jnp.float32),
                  jax.ShapeDtypeStruct((rows // 2, wp), jnp.float32))

    kernel = functools.partial(_convblock_kernel, h=h)
    skip2d, pool2d = pl.pallas_call(
        kernel,
        grid=(1,),
        out_shape=out_shapes,
        in_specs=[_full_spec(xpatch.shape), _full_spec(m1.shape),
                  _full_spec(m2.shape), _full_spec(vecs.shape),
                  _full_spec(gmat.shape), _full_spec(ssel.shape)],
        out_specs=(_full_spec((rows, l2)),
                   _full_spec((rows // 2, wp))),
        compiler_params=pltpu.CompilerParams(
            dimension_semantics=("arbitrary",),
            vmem_limit_bytes=32 * 1024 * 1024),
    )(xpatch, m1, m2, vecs, gmat, ssel)

    skip_nchw = skip2d.reshape(n, h, cout, w).transpose(0, 2, 1, 3)
    pooled_nchw = (pool2d[:, :lp].reshape(n, h // 2, cout, w // 2)
                   .transpose(0, 2, 1, 3))
    # TODO(synk): when pool=False the kernel still computes the (cheap) pooled
    # output; it is simply discarded here.
    out = pooled_nchw if pool else skip_nchw
    return out, skip_nchw


# --------------------------------------------------------------------------
# Pure-JAX/XLA reference with identical semantics (for validation).
# --------------------------------------------------------------------------
def _reference(x_nchw, params, pool=True):
    x = jnp.transpose(x_nchw, (0, 2, 3, 1)).astype(jnp.float32)

    def conv_bn_relu(t, wgt, b, g, beta):
        y = jax.lax.conv_general_dilated(
            t, wgt, window_strides=(1, 1), padding="SAME",
            dimension_numbers=("NHWC", "HWIO", "NHWC")) + b
        mean = jnp.mean(y, axis=(0, 1, 2), keepdims=True)
        var = jnp.var(y, axis=(0, 1, 2), keepdims=True)      # biased var (training BN)
        y = (y - mean) / jnp.sqrt(var + _EPS) * g + beta
        return jnp.maximum(y, 0.0)

    y = conv_bn_relu(x, params["w1"], params["b1"], params["g1"], params["beta1"])
    y = conv_bn_relu(y, params["w2"], params["b2"], params["g2"], params["beta2"])
    skip = y
    pooled = jax.lax.reduce_window(y, -jnp.inf, jax.lax.max,
                                   (1, 2, 2, 1), (1, 2, 2, 1), "VALID")
    out = pooled if pool else skip
    return (jnp.transpose(out, (0, 3, 1, 2)),
            jnp.transpose(skip, (0, 3, 1, 2)))


if __name__ == "__main__":
    in_ch, out_ch = 4, 8
    key = jax.random.PRNGKey(0)
    ks = jax.random.split(key, 9)
    # Deterministic synthetic parameters (shapes from ConvBlock.__init__).
    params = {
        "w1": 0.2 * jax.random.normal(ks[0], (3, 3, in_ch, out_ch), jnp.float32),   # HWIO
        "b1": 0.1 * jax.random.normal(ks[1], (out_ch,), jnp.float32),
        "g1": 1.0 + 0.1 * jax.random.normal(ks[2], (out_ch,), jnp.float32),
        "beta1": 0.1 * jax.random.normal(ks[3], (out_ch,), jnp.float32),
        "w2": 0.2 * jax.random.normal(ks[4], (3, 3, out_ch, out_ch), jnp.float32),  # HWIO
        "b2": 0.1 * jax.random.normal(ks[5], (out_ch,), jnp.float32),
        "g2": 1.0 + 0.1 * jax.random.normal(ks[6], (out_ch,), jnp.float32),
        "beta2": 0.1 * jax.random.normal(ks[7], (out_ch,), jnp.float32),
    }
    x = jax.random.normal(ks[8], (2, in_ch, 16, 16), jnp.float32)   # NCHW, like PyTorch

    out, skip = conv_block_forward(x, params, pool=True)
    out, skip = jax.block_until_ready((out, skip))

    ref_out, ref_skip = _reference(x, params, pool=True)
    assert out.shape == (2, out_ch, 8, 8) and skip.shape == (2, out_ch, 16, 16)
    # Conv matmul operands are bf16 (BN stats/apply stay f32), so compare
    # against the f32 XLA reference with a correspondingly looser tolerance.
    np.testing.assert_allclose(np.asarray(out), np.asarray(ref_out), rtol=3e-2, atol=3e-2)
    np.testing.assert_allclose(np.asarray(skip), np.asarray(ref_skip), rtol=3e-2, atol=3e-2)
    print("KERNEL_OK")
</pallas_src>

<mosaic_0001>
module attributes {stable_mosaic.version = 11 : i64} {
  func.func @_convblock_kernel(%arg0: i32, %arg1: memref<32x192xbf16, #tpu.memory_space<vmem>>, %arg2: memref<192x128xbf16, #tpu.memory_space<vmem>>, %arg3: memref<384x128xbf16, #tpu.memory_space<vmem>>, %arg4: memref<4x128xf32, #tpu.memory_space<vmem>>, %arg5: memref<128x128xf32, #tpu.memory_space<vmem>>, %arg6: memref<2x128x128xf32, #tpu.memory_space<vmem>>, %arg7: memref<32x128xf32, #tpu.memory_space<vmem>>, %arg8: memref<16x128xf32, #tpu.memory_space<vmem>>) attributes {dimension_semantics = [#tpu.dimension_semantics<arbitrary>], iteration_bounds = array<i64: 1>, scalar_prefetch = 0 : i64, scratch_operands = 0 : i64, tpu.core_type = #tpu.core_type<tc>, window_params = [{pipeline_mode = #tpu.pipeline_mode<synchronous>, transform_indices = @transform_0, window_bounds = array<i64: 32, 192>}, {pipeline_mode = #tpu.pipeline_mode<synchronous>, transform_indices = @transform_1, window_bounds = array<i64: 192, 128>}, {pipeline_mode = #tpu.pipeline_mode<synchronous>, transform_indices = @transform_2, window_bounds = array<i64: 384, 128>}, {pipeline_mode = #tpu.pipeline_mode<synchronous>, transform_indices = @transform_3, window_bounds = array<i64: 4, 128>}, {pipeline_mode = #tpu.pipeline_mode<synchronous>, transform_indices = @transform_4, window_bounds = array<i64: 128, 128>}, {pipeline_mode = #tpu.pipeline_mode<synchronous>, transform_indices = @transform_5, window_bounds = array<i64: 2, 128, 128>}, {pipeline_mode = #tpu.pipeline_mode<synchronous>, transform_indices = @transform_6, window_bounds = array<i64: 32, 128>}, {pipeline_mode = #tpu.pipeline_mode<synchronous>, transform_indices = @transform_7, window_bounds = array<i64: 16, 128>}]} {
    %c0 = arith.constant 0 : index
    %c0_0 = arith.constant 0 : index
    %0 = vector.load %arg1[%c0, %c0_0] : memref<32x192xbf16, #tpu.memory_space<vmem>>, vector<32x192xbf16>
    %c0_1 = arith.constant 0 : index
    %c0_2 = arith.constant 0 : index
    %1 = vector.load %arg2[%c0_1, %c0_2] : memref<192x128xbf16, #tpu.memory_space<vmem>>, vector<192x128xbf16>
    %cst = arith.constant dense<0.000000e+00> : vector<32x128xf32>
    %2 = tpu.matmul %0, %1, %cst {dimension_numbers = #tpu.dot_dimension_numbers<[1], [0], [0], [1], [0, 0, 1, 1], [], []>} : vector<32x192xbf16>, vector<192x128xbf16>, vector<32x128xf32> -> vector<32x128xf32>
    %c0_3 = arith.constant 0 : index
    %c0_4 = arith.constant 0 : index
    %3 = vector.load %arg4[%c0_3, %c0_4] : memref<4x128xf32, #tpu.memory_space<vmem>>, vector<1x128xf32>
    %c1 = arith.constant 1 : index
    %c0_5 = arith.constant 0 : index
    %4 = vector.load %arg4[%c1, %c0_5] : memref<4x128xf32, #tpu.memory_space<vmem>>, vector<1x128xf32>
    %cst_6 = arith.constant dense<0.000000e+00> : vector<128xf32>
    %5 = vector.multi_reduction <add>, %2, %cst_6 [0] : vector<32x128xf32> to vector<128xf32>
    %6 = vector.shape_cast %5 : vector<128xf32> to vector<1x128xf32>
    %7 = arith.mulf %2, %2 : vector<32x128xf32>
    %cst_7 = arith.constant dense<0.000000e+00> : vector<128xf32>
    %8 = vector.multi_reduction <add>, %7, %cst_7 [0] : vector<32x128xf32> to vector<128xf32>
    %9 = vector.shape_cast %8 : vector<128xf32> to vector<1x128xf32>
    %10 = tpu.concatenate %6, %9 in 0 : vector<1x128xf32>, vector<1x128xf32> -> vector<2x128xf32>
    %c0_8 = arith.constant 0 : index
    %c0_9 = arith.constant 0 : index
    %11 = vector.load %arg5[%c0_8, %c0_9] : memref<128x128xf32, #tpu.memory_space<vmem>>, vector<128x128xf32>
    %cst_10 = arith.constant dense<0.000000e+00> : vector<2x128xf32>
    %12 = tpu.matmul %10, %11, %cst_10 {dimension_numbers = #tpu.dot_dimension_numbers<[1], [0], [0], [1], [0, 0, 1, 1], [], []>} : vector<2x128xf32>, vector<128x128xf32>, vector<2x128xf32> -> vector<2x128xf32>
    %13 = vector.extract_strided_slice %12 {offsets = [0, 0], sizes = [1, 128], strides = [1, 1]} : vector<2x128xf32> to vector<1x128xf32>
    %14 = vector.extract_strided_slice %12 {offsets = [1, 0], sizes = [1, 128], strides = [1, 1]} : vector<2x128xf32> to vector<1x128xf32>
    %15 = arith.mulf %13, %13 : vector<1x128xf32>
    %16 = arith.subf %14, %15 : vector<1x128xf32>
    %cst_11 = arith.constant 9.99999974E-6 : f32
    %17 = vector.broadcast %cst_11 : f32 to vector<1x128xf32>
    %18 = arith.addf %16, %17 : vector<1x128xf32>
    %19 = math.rsqrt %18 : vector<1x128xf32>
    %20 = arith.mulf %3, %19 : vector<1x128xf32>
    %21 = arith.mulf %13, %20 : vector<1x128xf32>
    %22 = arith.subf %4, %21 : vector<1x128xf32>
    %23 = vector.broadcast %20 : vector<1x128xf32> to vector<32x128xf32>
    %24 = arith.mulf %2, %23 : vector<32x128xf32>
    %25 = vector.broadcast %22 : vector<1x128xf32> to vector<32x128xf32>
    %26 = arith.addf %24, %25 : vector<32x128xf32>
    %cst_12 = arith.constant 0.000000e+00 : f32
    %27 = vector.broadcast %cst_12 : f32 to vector<32x128xf32>
    %28 = arith.maximumf %26, %27 : vector<32x128xf32>
    %29 = tpu.iota {dimensions = array<i32: 0>} : vector<32x128xi32>
    %c16_i32 = arith.constant 16 : i32
    %c0_i32 = arith.constant 0 : i32
    %30 = arith.cmpi eq, %c16_i32, %c0_i32 : i32
    %c1_i32 = arith.constant 1 : i32
    %31 = arith.select %30, %c1_i32, %c16_i32 : i32
    %32 = vector.broadcast %31 : i32 to vector<32x128xi32>
    %33 = arith.remsi %29, %32 : vector<32x128xi32>
    %c0_i32_13 = arith.constant 0 : i32
    %34 = vector.broadcast %c0_i32_13 : i32 to vector<32x128xi32>
    %35 = arith.cmpi ne, %33, %34 : vector<32x128xi32>
    %c0_i32_14 = arith.constant 0 : i32
    %36 = vector.broadcast %c0_i32_14 : i32 to vector<32x128xi32>
    %37 = arith.cmpi slt, %33, %36 : vector<32x128xi32>
    %c0_i32_15 = arith.constant 0 : i32
    %38 = arith.cmpi slt, %31, %c0_i32_15 : i32
    %39 = vector.broadcast %38 : i1 to vector<32x128xi1>
    %40 = vector.broadcast %39 : vector<32x128xi1> to vector<32x128xi1>
    %41 = arith.xori %37, %40 : vector<32x128xi1>
    %42 = arith.andi %41, %35 : vector<32x128xi1>
    %43 = vector.broadcast %31 : i32 to vector<32x128xi32>
    %44 = arith.addi %33, %43 : vector<32x128xi32>
    %45 = arith.select %42, %44, %33 : vector<32x128xi1>, vector<32x128xi32>
    %c0_i32_16 = arith.constant 0 : i32
    %46 = vector.broadcast %c0_i32_16 : i32 to vector<32x128xi32>
    %47 = arith.cmpi eq, %45, %46 : vector<32x128xi32>
    %c1_i32_17 = arith.constant 1 : i32
    %48 = tpu.dynamic_rotate %28 by %c1_i32_17 dim 0 : vector<32x128xf32>, i32 -> vector<32x128xf32>
    %cst_18 = arith.constant 0.000000e+00 : f32
    %49 = vector.broadcast %cst_18 : f32 to vector<32x128xf32>
    %50 = arith.select %47, %49, %48 : vector<32x128xi1>, vector<32x128xf32>
    %51 = arith.truncf %50 : vector<32x128xf32> to vector<32x128xbf16>
    %c15_i32 = arith.constant 15 : i32
    %52 = vector.broadcast %c15_i32 : i32 to vector<32x128xi32>
    %53 = arith.cmpi eq, %45, %52 : vector<32x128xi32>
    %c31_i32 = arith.constant 31 : i32
    %54 = tpu.dynamic_rotate %28 by %c31_i32 dim 0 : vector<32x128xf32>, i32 -> vector<32x128xf32>
    %cst_19 = arith.constant 0.000000e+00 : f32
    %55 = vector.broadcast %cst_19 : f32 to vector<32x128xf32>
    %56 = arith.select %53, %55, %54 : vector<32x128xi1>, vector<32x128xf32>
    %57 = arith.truncf %56 : vector<32x128xf32> to vector<32x128xbf16>
    %58 = arith.truncf %28 : vector<32x128xf32> to vector<32x128xbf16>
    %59 = tpu.concatenate %51, %58, %57 in 1 : vector<32x128xbf16>, vector<32x128xbf16>, vector<32x128xbf16> -> vector<32x384xbf16>
    %c0_20 = arith.constant 0 : index
    %c0_21 = arith.constant 0 : index
    %60 = vector.load %arg3[%c0_20, %c0_21] : memref<384x128xbf16, #tpu.memory_space<vmem>>, vector<384x128xbf16>
    %cst_22 = arith.constant dense<0.000000e+00> : vector<32x128xf32>
    %61 = tpu.matmul %59, %60, %cst_22 {dimension_numbers = #tpu.dot_dimension_numbers<[1], [0], [0], [1], [0, 0, 1, 1], [], []>} : vector<32x384xbf16>, vector<384x128xbf16>, vector<32x128xf32> -> vector<32x128xf32>
    %c2 = arith.constant 2 : index
    %c0_23 = arith.constant 0 : index
    %62 = vector.load %arg4[%c2, %c0_23] : memref<4x128xf32, #tpu.memory_space<vmem>>, vector<1x128xf32>
    %c3 = arith.constant 3 : index
    %c0_24 = arith.constant 0 : index
    %63 = vector.load %arg4[%c3, %c0_24] : memref<4x128xf32, #tpu.memory_space<vmem>>, vector<1x128xf32>
    %cst_25 = arith.constant dense<0.000000e+00> : vector<128xf32>
    %64 = vector.multi_reduction <add>, %61, %cst_25 [0] : vector<32x128xf32> to vector<128xf32>
    %65 = vector.shape_cast %64 : vector<128xf32> to vector<1x128xf32>
    %66 = arith.mulf %61, %61 : vector<32x128xf32>
    %cst_26 = arith.constant dense<0.000000e+00> : vector<128xf32>
    %67 = vector.multi_reduction <add>, %66, %cst_26 [0] : vector<32x128xf32> to vector<128xf32>
    %68 = vector.shape_cast %67 : vector<128xf32> to vector<1x128xf32>
    %69 = tpu.concatenate %65, %68 in 0 : vector<1x128xf32>, vector<1x128xf32> -> vector<2x128xf32>
    %c0_27 = arith.constant 0 : index
    %c0_28 = arith.constant 0 : index
    %70 = vector.load %arg5[%c0_27, %c0_28] : memref<128x128xf32, #tpu.memory_space<vmem>>, vector<128x128xf32>
    %cst_29 = arith.constant dense<0.000000e+00> : vector<2x128xf32>
    %71 = tpu.matmul %69, %70, %cst_29 {dimension_numbers = #tpu.dot_dimension_numbers<[1], [0], [0], [1], [0, 0, 1, 1], [], []>} : vector<2x128xf32>, vector<128x128xf32>, vector<2x128xf32> -> vector<2x128xf32>
    %72 = vector.extract_strided_slice %71 {offsets = [0, 0], sizes = [1, 128], strides = [1, 1]} : vector<2x128xf32> to vector<1x128xf32>
    %73 = vector.extract_strided_slice %71 {offsets = [1, 0], sizes = [1, 128], strides = [1, 1]} : vector<2x128xf32> to vector<1x128xf32>
    %74 = arith.mulf %72, %72 : vector<1x128xf32>
    %75 = arith.subf %73, %74 : vector<1x128xf32>
    %cst_30 = arith.constant 9.99999974E-6 : f32
    %76 = vector.broadcast %cst_30 : f32 to vector<1x128xf32>
    %77 = arith.addf %75, %76 : vector<1x128xf32>
    %78 = math.rsqrt %77 : vector<1x128xf32>
    %79 = arith.mulf %62, %78 : vector<1x128xf32>
    %80 = arith.mulf %72, %79 : vector<1x128xf32>
    %81 = arith.subf %63, %80 : vector<1x128xf32>
    %82 = vector.broadcast %79 : vector<1x128xf32> to vector<32x128xf32>
    %83 = arith.mulf %61, %82 : vector<32x128xf32>
    %84 = vector.broadcast %81 : vector<1x128xf32> to vector<32x128xf32>
    %85 = arith.addf %83, %84 : vector<32x128xf32>
    %cst_31 = arith.constant 0.000000e+00 : f32
    %86 = vector.broadcast %cst_31 : f32 to vector<32x128xf32>
    %87 = arith.maximumf %85, %86 : vector<32x128xf32>
    %c0_32 = arith.constant 0 : index
    %c0_33 = arith.constant 0 : index
    %88 = vector.load %arg7[%c0_32, %c0_33] : memref<32x128xf32, #tpu.memory_space<vmem>>, vector<32x128xf32>
    tpu.vector_store %arg7[%c0_32, %c0_33], %87 {strides = array<i32>} : memref<32x128xf32, #tpu.memory_space<vmem>>, vector<32x128xf32>,
    %89 = vector.shape_cast %87 : vector<32x128xf32> to vector<16x2x128xf32>
    %90 = vector.extract_strided_slice %89 {offsets = [0, 0, 0], sizes = [16, 1, 128], strides = [1, 1, 1]} : vector<16x2x128xf32> to vector<16x1x128xf32>
    %91 = vector.shape_cast %90 : vector<16x1x128xf32> to vector<16x128xf32>
    %92 = vector.extract_strided_slice %89 {offsets = [0, 1, 0], sizes = [16, 1, 128], strides = [1, 1, 1]} : vector<16x2x128xf32> to vector<16x1x128xf32>
    %93 = vector.shape_cast %92 : vector<16x1x128xf32> to vector<16x128xf32>
    %94 = arith.maximumf %91, %93 : vector<16x128xf32>
    %c0_34 = arith.constant 0 : index
    %c0_35 = arith.constant 0 : index
    %c0_36 = arith.constant 0 : index
    %95 = vector.load %arg6[%c0_34, %c0_35, %c0_36] : memref<2x128x128xf32, #tpu.memory_space<vmem>>, vector<1x128x128xf32>
    %96 = vector.shape_cast %95 : vector<1x128x128xf32> to vector<128x128xf32>
    %cst_37 = arith.constant dense<0.000000e+00> : vector<16x128xf32>
    %97 = tpu.matmul %94, %96, %cst_37 {dimension_numbers = #tpu.dot_dimension_numbers<[1], [0], [0], [1], [0, 0, 1, 1], [], []>} : vector<16x128xf32>, vector<128x128xf32>, vector<16x128xf32> -> vector<16x128xf32>
    %c1_38 = arith.constant 1 : index
    %c0_39 = arith.constant 0 : index
    %c0_40 = arith.constant 0 : index
    %98 = vector.load %arg6[%c1_38, %c0_39, %c0_40] : memref<2x128x128xf32, #tpu.memory_space<vmem>>, vector<1x128x128xf32>
    %99 = vector.shape_cast %98 : vector<1x128x128xf32> to vector<128x128xf32>
    %cst_41 = arith.constant dense<0.000000e+00> : vector<16x128xf32>
    %100 = tpu.matmul %94, %99, %cst_41 {dimension_numbers = #tpu.dot_dimension_numbers<[1], [0], [0], [1], [0, 0, 1, 1], [], []>} : vector<16x128xf32>, vector<128x128xf32>, vector<16x128xf32> -> vector<16x128xf32>
    %101 = arith.maximumf %97, %100 : vector<16x128xf32>
    %c0_42 = arith.constant 0 : index
    %c0_43 = arith.constant 0 : index
    %102 = vector.load %arg8[%c0_42, %c0_43] : memref<16x128xf32, #tpu.memory_space<vmem>>, vector<16x128xf32>
    tpu.vector_store %arg8[%c0_42, %c0_43], %101 {strides = array<i32>} : memref<16x128xf32, #tpu.memory_space<vmem>>, vector<16x128xf32>,
    return
  }
  func.func @transform_0(%arg0: i32) -> (i32, i32) {
    %c0_i32 = arith.constant 0 : i32
    %c0_i32_0 = arith.constant 0 : i32
    %c0_i32_1 = arith.constant 0 : i32
    return %c0_i32, %c0_i32_0 : i32, i32
  }
  func.func @transform_1(%arg0: i32) -> (i32, i32) {
    %c0_i32 = arith.constant 0 : i32
    %c0_i32_0 = arith.constant 0 : i32
    %c0_i32_1 = arith.constant 0 : i32
    return %c0_i32, %c0_i32_0 : i32, i32
  }
  func.func @transform_2(%arg0: i32) -> (i32, i32) {
    %c0_i32 = arith.constant 0 : i32
    %c0_i32_0 = arith.constant 0 : i32
    %c0_i32_1 = arith.constant 0 : i32
    return %c0_i32, %c0_i32_0 : i32, i32
  }
  func.func @transform_3(%arg0: i32) -> (i32, i32) {
    %c0_i32 = arith.constant 0 : i32
    %c0_i32_0 = arith.constant 0 : i32
    %c0_i32_1 = arith.constant 0 : i32
    return %c0_i32, %c0_i32_0 : i32, i32
  }
  func.func @transform_4(%arg0: i32) -> (i32, i32) {
    %c0_i32 = arith.constant 0 : i32
    %c0_i32_0 = arith.constant 0 : i32
    %c0_i32_1 = arith.constant 0 : i32
    return %c0_i32, %c0_i32_0 : i32, i32
  }
  func.func @transform_5(%arg0: i32) -> (i32, i32, i32) {
    %c0_i32 = arith.constant 0 : i32
    %c0_i32_0 = arith.constant 0 : i32
    %c0_i32_1 = arith.constant 0 : i32
    %c0_i32_2 = arith.constant 0 : i32
    return %c0_i32, %c0_i32_0, %c0_i32_1 : i32, i32, i32
  }
  func.func @transform_6(%arg0: i32) -> (i32, i32) {
    %c0_i32 = arith.constant 0 : i32
    %c0_i32_0 = arith.constant 0 : i32
    %c0_i32_1 = arith.constant 0 : i32
    return %c0_i32, %c0_i32_0 : i32, i32
  }
  func.func @transform_7(%arg0: i32) -> (i32, i32) {
    %c0_i32 = arith.constant 0 : i32
    %c0_i32_0 = arith.constant 0 : i32
    %c0_i32_1 = arith.constant 0 : i32
    return %c0_i32, %c0_i32_0 : i32, i32
  }
}

</mosaic_0001>

<bundles_post_ra>
// kernel: tpu_custom_call.1
= control target key start
LH: loop header
LB: loop body
LE: loop exit
PB: predicated region body
PF: predicated region fallthrough
CT: control target
= control target key end

     0   :  { %13 = vsyncpa [#allocation3], 0  ;;  %s2454_s0 = inlined_call_operand.hbm [shape: bf16[32,192], index: 0, kind: input, shape index: {}]   ;;  %s2455_s1 = inlined_call_operand.hbm [shape: bf16[192,128], index: 1, kind: input, shape index: {}]   ;;  %s2456_s2 = inlined_call_operand.hbm [shape: bf16[384,128], index: 2, kind: input, shape index: {}]   ;;  %s2457_s3 = inlined_call_operand.vmem [shape: f32[4,128], index: 3, kind: input, shape index: {}]   ;;  %s2458_s4 = inlined_call_operand.hbm [shape: f32[128,128], index: 4, kind: input, shape index: {}]   ;;  %s2459_s5 = inlined_call_operand.hbm [shape: f32[2,128,128], index: 5, kind: input, shape index: {}]   ;;  %s2460_s6 = inlined_call_operand.hbm [shape: f32[32,128], index: 6, kind: output, shape index: {0}]   ;;  %s2461_s7 = inlined_call_operand.hbm [shape: f32[16,128], index: 7, kind: output, shape index: {1}]  }
   0x1   :  { %14 = vsyncpa [#allocation6], 0 }
   0x2   :  { %15 = vsyncpa [#allocation9], 0 }
   0x3   :  { %16 = vsyncpa [#allocation4], 0 }
   0x4   :  { %17 = vsyncpa [#allocation13], 0  ;;  %s2092_s24 = smov [#allocation5]   ;;  %s1928_s28 = scalar_lea.hbm %s2455_s1, 1536 }
   0x5   :  { %s35_s25 = sshll.u32 %s2092_s24, 4  ;;  %p1929_p0 = scmp.ne.s32.totalorder %s2455_s1, %s1928_s28  ;;  %s36_s25 = int_to_ptr.vmem [resolvable:$true] %s35_s25 }
   0x6   :  { %p1932_p1 = scmp.lt.u32.totalorder %s1928_s28, %s2455_s1 }
   0x8   :  { %p1934_p2 = pnand %p1932_p1, %p1929_p0 }
   0xa   :  { %1937 = shalt.err (!%p1934_p2)
}
   0xb   :  { %s1938_s10 = scalar_lea.vmem %s36_s25, 1536  ;;  %p1943_p4 = scmp.lt.s32.totalorder %s36_s25, %s36_s25 }
   0xc   :  { %p1939_p3 = scmp.ne.s32.totalorder %s36_s25, %s1938_s10  ;;  %p1944_p5 = scmp.lt.s32.totalorder %s1938_s10, %s1938_s10 }
   0xe   :  { %p1945_p6 = por %p1944_p5, %p1943_p4 }
  0x10   :  { %p1946_p7 = pnand %p1945_p6, %p1939_p3 }
  0x12   :  { %1949 = shalt.err (!%p1946_p7)
}
  0x13   :  { %s2093_s11 = smov 64   ;;  %s2094_s12 = smov 4  }
  0x14   :  { %41 = dma.hbm_to_vmem [thread:$0]  %s2455_s1, 1536, %s36_s25, [#allocation6], %s2093_s11, %s2093_s11, %s2094_s12  }
  0x15   :  { %s2095_s15 = smov [#allocation8]   ;;  %s2096_s17 = smov [#allocation2]  }
  0x16   :  { %s61_s16 = sshll.u32 %s2095_s15, 4  ;;  %s23_s18 = sshll.u32 %s2096_s17, 4  ;;  %s62_s16 = int_to_ptr.vmem [resolvable:$true] %s61_s16  ;;  %s24_s18 = int_to_ptr.vmem [resolvable:$true] %s23_s18 }
  0x17   :  { %s1950_s21 = scalar_lea.hbm %s2458_s4, 2048 }
  0x18   :  { %p1951_p8 = scmp.ne.s32.totalorder %s2458_s4, %s1950_s21  ;;  %p1954_p9 = scmp.lt.u32.totalorder %s1950_s21, %s2458_s4 }
  0x1a   :  { %p1956_p10 = pnand %p1954_p9, %p1951_p8 }
  0x1c   :  { %1959 = shalt.err (!%p1956_p10)
}
  0x1d   :  { %s1960_s1 = scalar_lea.vmem %s62_s16, 2048  ;;  %p1965_p12 = scmp.lt.s32.totalorder %s62_s16, %s62_s16 }
  0x1e   :  { %p1961_p11 = scmp.ne.s32.totalorder %s62_s16, %s1960_s1  ;;  %p1966_p13 = scmp.lt.s32.totalorder %s1960_s1, %s1960_s1 }
  0x20   :  { %p1967_p0 = por %p1966_p13, %p1965_p12 }
  0x22   :  { %p1968_p1 = pnand %p1967_p0, %p1961_p11 }
  0x24   :  { %1971 = shalt.err (!%p1968_p1)
}
  0x25   :  { %s2097_s25 = smov 128   ;;  %s2098_s27 = smov 8  }
  0x26   :  { %67 = dma.hbm_to_vmem [thread:$0]  %s2458_s4, 2048, %s62_s16, [#allocation9], %s2097_s25, %s2097_s25, %s2098_s27  }
  0x27   :  { %s1972_s9 = scalar_lea.hbm %s2454_s0, 512 }
  0x28   :  { %p1973_p2 = scmp.ne.s32.totalorder %s2454_s0, %s1972_s9  ;;  %p1976_p3 = scmp.lt.u32.totalorder %s1972_s9, %s2454_s0 }
  0x2a   :  { %p1978_p4 = pnand %p1976_p3, %p1973_p2 }
  0x2c   :  { %1981 = shalt.err (!%p1978_p4)
}
  0x2d   :  { %s1982_s17 = scalar_lea.vmem %s24_s18, 512  ;;  %p1987_p6 = scmp.lt.s32.totalorder %s24_s18, %s24_s18 }
  0x2e   :  { %p1983_p5 = scmp.ne.s32.totalorder %s24_s18, %s1982_s17  ;;  %p1988_p7 = scmp.lt.s32.totalorder %s1982_s17, %s1982_s17 }
  0x30   :  { %p1989_p8 = por %p1988_p7, %p1987_p6 }
  0x32   :  { %p1990_p9 = pnand %p1989_p8, %p1983_p5 }
  0x34   :  { %1993 = shalt.err (!%p1990_p9)
}
  0x35   :  { %29 = dma.hbm_to_vmem [thread:$0]  %s2454_s0, 512, %s24_s18, [#allocation3], %s2097_s25, %s2097_s25, %s2098_s27  }
  0x36   :  { %s2099_s19 = smov [#allocation7]   ;;  %s2100_s21 = smov [#allocation10]  }
  0x37   :  { %s47_s20 = sshll.u32 %s2099_s19, 4  ;;  %s73_s22 = sshll.u32 %s2100_s21, 4  ;;  %s48_s20 = int_to_ptr.vmem [resolvable:$true] %s47_s20  ;;  %s74_s22 = int_to_ptr.vmem [resolvable:$true] %s73_s22 }
  0x38   :  { %s1994_s26 = scalar_lea.hbm %s2456_s2, 3072 }
  0x39   :  { %p1995_p10 = scmp.ne.s32.totalorder %s2456_s2, %s1994_s26  ;;  %p1998_p11 = scmp.lt.u32.totalorder %s1994_s26, %s2456_s2 }
  0x3b   :  { %p2000_p12 = pnand %p1998_p11, %p1995_p10 }
  0x3d   :  { %2003 = shalt.err (!%p2000_p12)
}
  0x3e   :  { %s2004_s0 = scalar_lea.vmem %s48_s20, 3072  ;;  %p2009_p0 = scmp.lt.s32.totalorder %s48_s20, %s48_s20 }
  0x3f   :  { %p2005_p13 = scmp.ne.s32.totalorder %s48_s20, %s2004_s0  ;;  %p2010_p1 = scmp.lt.s32.totalorder %s2004_s0, %s2004_s0 }
  0x41   :  { %p2011_p2 = por %p2010_p1, %p2009_p0 }
  0x43   :  { %p2012_p3 = pnand %p2011_p2, %p2005_p13 }
  0x45   :  { %2015 = shalt.err (!%p2012_p3)
}
  0x46   :  { %53 = dma.hbm_to_vmem [thread:$0]  %s2456_s2, 3072, %s48_s20, [#allocation6], %s2093_s11, %s2093_s11, %s2094_s12  }
  0x47   :  { %s2016_s13 = scalar_lea.hbm %s2459_s5, 4096 }
  0x48   :  { %p2017_p4 = scmp.ne.s32.totalorder %s2459_s5, %s2016_s13  ;;  %p2020_p5 = scmp.lt.u32.totalorder %s2016_s13, %s2459_s5 }
  0x4a   :  { %p2022_p6 = pnand %p2020_p5, %p2017_p4 }
  0x4c   :  { %2025 = shalt.err (!%p2022_p6)
}
  0x4d   :  { %s2026_s16 = scalar_lea.vmem %s74_s22, 4096  ;;  %p2031_p8 = scmp.lt.s32.totalorder %s74_s22, %s74_s22 }
  0x4e   :  { %p2027_p7 = scmp.ne.s32.totalorder %s74_s22, %s2026_s16  ;;  %p2032_p9 = scmp.lt.s32.totalorder %s2026_s16, %s2026_s16 }
  0x50   :  { %p2033_p10 = por %p2032_p9, %p2031_p8 }
  0x52   :  { %p2034_p11 = pnand %p2033_p10, %p2027_p7 }
  0x54   :  { %2037 = shalt.err (!%p2034_p11)
}
  0x55   :  { %79 = dma.hbm_to_vmem [thread:$0]  %s2459_s5, 4096, %s74_s22, [#allocation9], %s2097_s25, %s2097_s25, %s2098_s27  }
  0x56   :  { %2082 = dma.done.wait [#allocation3], 512  }
  0x57   :  { %2083 = vsyncadd [#allocation3], 4294966784 }
  0x58   :  { %2084 = dma.done.wait [#allocation6], 4608  }
  0x59   :  { %2085 = vsyncadd [#allocation6], 4294962688 }
  0x5a   :  { %2086 = dma.done.wait [#allocation9], 6144  }
  0x5b   :  { %2087 = vsyncadd [#allocation9], 4294961152  ;;  %v2101_v0 = vmov 0   ;;  %v2102_v1 = vmov 0.0|0.0   ;;  %v1882_v2 = vld [vmem:[#allocation5] sm:$0xff]   ;;  %v1883_v3 = vld [vmem:[#allocation5 + $0x8] sm:$0xff]  }
  0x5c   :  { %221 = vmatprep.subr.bf16.mxu0 %v2101_v0  ;;  %1753 = vmatprep.subr.bf16.mxu1 %v2102_v1  ;;  %v1884_v4 = vld [vmem:[#allocation5 + $0x10] sm:$0xff]   ;;  %v1885_v5 = vld [vmem:[#allocation5 + $0x18] sm:$0xff]   ;;  %vm214_vm0 = vcmask 523264   ;;  %v1896_v6 = vld [vmem:[#allocation2 + $0x4] ss:$8 sps:$4 sm:$0xff]   ;;  %vm2103_vm1 = vmmov 0  }
  0x5d   :  { %222 = vmatpush1.bf16.msra.mxu0 %v1882_v2  ;;  %v1886_v7 = vld [vmem:[#allocation5 + $0x20] sm:$0xff]   ;;  %1423 = vmatprep.mubr.msk.bf16.mxu0 %vm214_vm0, %v1896_v6  ;;  %v297_v9 = vld [vmem:[#allocation8 + $0x8] sm:$0xff]  ;;  %v1888_v12 = vld [vmem:[#allocation5 + $0x30] sm:$0xff]   ;;  %v2104_v41 = vmov 0.0   ;;  %vm294_vm2 = vcmask 1040384   ;;  %vm2105_vm8 = vmmov 1  }
  0x5e   :  { %223 = vmatprep.subr.bf16.mxu0 %v2101_v0  ;;  %v296_v8 = vld [vmem:[#allocation8] sm:$0xff]  ;;  %v1887_v10 = vld [vmem:[#allocation5 + $0x28] sm:$0xff]   ;;  %v1889_v13 = vld [vmem:[#allocation5 + $0x38] sm:$0xff]   ;;  %1625 = vmatprep.mubr.msk.f32.mxu1 %vm2103_vm1, %v2104_v41  ;;  %vm1178_vm14 = vcmask 1041409   ;;  %vm1180_vm15 = vcmask 1042434  }
  0x5f   :  { %v2226_v11 = vpack.c.bf16 %v297_v9, %v296_v8  ;;  %v1890_v14 = vld [vmem:[#allocation5 + $0x40] sm:$0xff]   ;;  %v1891_v15 = vld [vmem:[#allocation5 + $0x48] sm:$0xff]   ;;  %v1892_v16 = vld [vmem:[#allocation5 + $0x50] sm:$0xff]  }
  0x60   :  { %v1893_v17 = vld [vmem:[#allocation5 + $0x58] sm:$0xff]   ;;  %v1894_v18 = vld [vmem:[#allocation2] ss:$8 sps:$4 sm:$0xff]   ;;  %v298_v21 = vld [vmem:[#allocation8 + $0x10] sm:$0xff] }
  0x61   :  { %224 = vmatpush1.bf16.msra.mxu0 %v1883_v3  ;;  %1755 = vmatpush3.bf16.msra.mxu1 %v2226_v11  ;;  %v1897_v19 = vld [vmem:[#allocation2 + $0x14] ss:$8 sps:$4 sm:$0xff]   ;;  %v1899_v20 = vld [vmem:[#allocation2 + $0x10] ss:$8 sps:$4 sm:$0xff]   ;;  %v300_v24 = vld [vmem:[#allocation8 + $0x20] sm:$0xff] }
  0x62   :  { %225 = vmatprep.subr.bf16.mxu0 %v2101_v0  ;;  %1756 = vmatprep.subr.bf16.mxu1 %v2102_v1  ;;  %v299_v22 = vld [vmem:[#allocation8 + $0x18] sm:$0xff]  ;;  %v301_v25 = vld [vmem:[#allocation8 + $0x28] sm:$0xff]  ;;  %v302_v27 = vld [vmem:[#allocation8 + $0x30] sm:$0xff] }
  0x63   :  { %v2231_v23 = vpack.c.bf16 %v299_v22, %v298_v21  ;;  %v2235_v26 = vpack.c.bf16 %v301_v25, %v300_v24  ;;  %v303_v28 = vld [vmem:[#allocation8 + $0x38] sm:$0xff]  ;;  %v304_v30 = vld [vmem:[#allocation8 + $0x40] sm:$0xff]  ;;  %v305_v31 = vld [vmem:[#allocation8 + $0x48] sm:$0xff] }
  0x64   :  { %v2239_v29 = vpack.c.bf16 %v303_v28, %v302_v27  ;;  %v2243_v32 = vpack.c.bf16 %v305_v31, %v304_v30  ;;  %v306_v33 = vld [vmem:[#allocation8 + $0x50] sm:$0xff]  ;;  %v307_v34 = vld [vmem:[#allocation8 + $0x58] sm:$0xff]  ;;  %v308_v36 = vld [vmem:[#allocation8 + $0x60] sm:$0xff] }
  0x65   :  { %226 = vmatpush1.bf16.msra.mxu0 %v1884_v4  ;;  %1758 = vmatpush3.bf16.msra.mxu1 %v2231_v23  ;;  %v2247_v35 = vpack.c.bf16 %v307_v34, %v306_v33  ;;  %v309_v37 = vld [vmem:[#allocation8 + $0x68] sm:$0xff]  ;;  %v310_v39 = vld [vmem:[#allocation8 + $0x70] sm:$0xff]  ;;  %v311_v40 = vld [vmem:[#allocation8 + $0x78] sm:$0xff] }
  0x66   :  { %227 = vmatprep.subr.bf16.mxu0 %v2101_v0  ;;  %1759 = vmatprep.subr.bf16.mxu1 %v2102_v1  ;;  %v2251_v38 = vpack.c.bf16 %v309_v37, %v308_v36  ;;  %v2256_v42 = vpack.c.bf16 %v311_v40, %v310_v39  ;;  %v1909_v21 = vld [vmem:[#allocation7 + $0x58] sm:$0xff]   ;;  %v1912_v25 = vld [vmem:[#allocation7 + $0x60] sm:$0xff]   ;;  %v1915_v30 = vld [vmem:[#allocation7 + $0x68] sm:$0xff]  }
  0x67   :  { %v1910_v22 = vld [vmem:[#allocation7 + $0x18] sm:$0xff]   ;;  %v1913_v27 = vld [vmem:[#allocation7 + $0x20] sm:$0xff]   ;;  %v1916_v31 = vld [vmem:[#allocation7 + $0x28] sm:$0xff]  }
  0x68   :  { %v1911_v24 = vld [vmem:[#allocation7 + $0x98] sm:$0xff]   ;;  %v1914_v28 = vld [vmem:[#allocation7 + $0xa0] sm:$0xff]   ;;  %v1917_v33 = vld [vmem:[#allocation7 + $0xa8] sm:$0xff]  }
  0x69   :  { %228 = vmatpush1.bf16.msra.mxu0 %v1885_v5  ;;  %1761 = vmatpush3.bf16.msra.mxu1 %v2235_v26  ;;  %v1918_v34 = vld [vmem:[#allocation7 + $0x70] sm:$0xff]   ;;  %v1921_v39 = vld [vmem:[#allocation7 + $0x78] sm:$0xff]  }
  0x6a   :  { %229 = vmatprep.subr.bf16.mxu0 %v2101_v0  ;;  %1762 = vmatprep.subr.bf16.mxu1 %v2102_v1  ;;  %v1919_v36 = vld [vmem:[#allocation7 + $0x30] sm:$0xff]   ;;  %v1922_v40 = vld [vmem:[#allocation7 + $0x38] sm:$0xff]  }
  0x6b   :  { %v1920_v37 = vld [vmem:[#allocation7 + $0xb0] sm:$0xff]  }
  0x6d   :  { %230 = vmatpush1.bf16.msra.mxu0 %v1886_v7  ;;  %1764 = vmatpush3.bf16.msra.mxu1 %v2239_v29 }
  0x6e   :  { %231 = vmatprep.subr.bf16.mxu0 %v2101_v0  ;;  %1765 = vmatprep.subr.bf16.mxu1 %v2102_v1 }
  0x71   :  { %232 = vmatpush1.bf16.msra.mxu0 %v1887_v10  ;;  %1767 = vmatpush3.bf16.msra.mxu1 %v2243_v32 }
  0x72   :  { %233 = vmatprep.subr.bf16.mxu0 %v2101_v0  ;;  %1768 = vmatprep.subr.bf16.mxu1 %v2102_v1 }
  0x75   :  { %234 = vmatpush1.bf16.msra.mxu0 %v1888_v12  ;;  %1770 = vmatpush3.bf16.msra.mxu1 %v2247_v35  ;;  %v1900_v12 = vld [vmem:[#allocation7 + $0x40] sm:$0xff]  }
  0x76   :  { %235 = vmatprep.subr.bf16.mxu0 %v2101_v0  ;;  %1771 = vmatprep.subr.bf16.mxu1 %v2102_v1 }
  0x79   :  { %236 = vmatpush1.bf16.msra.mxu0 %v1889_v13  ;;  %1773 = vmatpush3.bf16.msra.mxu1 %v2251_v38  ;;  %v1901_v13 = vld [vmem:[#allocation7] sm:$0xff]  }
  0x7a   :  { %237 = vmatprep.subr.bf16.mxu0 %v2101_v0  ;;  %1774 = vmatprep.subr.bf16.mxu1 %v2102_v1 }
  0x7d   :  { %238 = vmatpush1.bf16.msra.mxu0 %v1890_v14  ;;  %1776 = vmatpush3.bf16.msra.mxu1 %v2256_v42  ;;  %v1902_v14 = vld [vmem:[#allocation7 + $0x80] sm:$0xff]  }
  0x7e   :  { %239 = vmatprep.subr.bf16.mxu0 %v2101_v0  ;;  %1502 = vmatprep.subr.bf16.mxu1 %v1900_v12 }
  0x81   :  { %240 = vmatpush1.bf16.msra.mxu0 %v1891_v15  ;;  %v1903_v15 = vld [vmem:[#allocation7 + $0x48] sm:$0xff]  }
  0x82   :  { %241 = vmatprep.subr.bf16.mxu0 %v2101_v0 }
  0x85   :  { %242 = vmatpush1.bf16.msra.mxu0 %v1892_v16  ;;  %v1904_v16 = vld [vmem:[#allocation7 + $0x8] sm:$0xff]  }
  0x86   :  { %243 = vmatprep.subr.bf16.mxu0 %v2101_v0 }
  0x89   :  { %244 = vmatpush1.bf16.msra.mxu0 %v1893_v17  ;;  %v1905_v17 = vld [vmem:[#allocation7 + $0x88] sm:$0xff]  }
  0x8a   :  { %1628 = vmatprep.subr.bf16.mxu0 %v1902_v14 }
  0x8c   :  { %254 = vmatmul.mubr.bf16.vlgmr.msra.gmra.mrb[0].mxu0 %v1894_v18  ;;  %v1906_v18 = vld [vmem:[#allocation7 + $0x50] sm:$0xff]  }
  0x8d   :  { %1424 = vmatprep.mubr.msk.bf16.mxu0 %vm214_vm0, %v1897_v19  ;;  %1629 = vmatpush3.bf16.msra.mxu0 %v1902_v14  ;;  %v1907_v19 = vld [vmem:[#allocation7 + $0x10] sm:$0xff]   ;;  %vm1182_vm0 = vcmask 1043459  }
  0x8e   :  { %1630 = vmatprep.subr.bf16.mxu0 %v1905_v17 }
  0x91   :  { %1631 = vmatpush3.bf16.msra.mxu0 %v1905_v17 }
  0x94   :  { %262 = vmatmul.mubr.bf16.gmra.mrb[4].mxu0 %v1899_v20  ;;  %v1908_v20 = vld [vmem:[#allocation7 + $0x90] sm:$0xff]  }
  0x95   :  { %1632 = vmatprep.subr.bf16.mxu0 %v1908_v20 }
  0x96   :  { %1633 = vmatpush3.bf16.msra.mxu0 %v1908_v20 }
  0x97   :  { %1634 = vmatprep.subr.bf16.mxu0 %v1911_v24 }
  0x9a   :  { %1635 = vmatpush3.bf16.msra.mxu0 %v1911_v24 }
  0x9b   :  { %1636 = vmatprep.subr.bf16.mxu0 %v1914_v28 }
  0x9e   :  { %1637 = vmatpush3.bf16.msra.mxu0 %v1914_v28 }
  0x9f   :  { %1638 = vmatprep.subr.bf16.mxu0 %v1917_v33 }
  0xa2   :  { %1639 = vmatpush3.bf16.msra.mxu0 %v1917_v33  ;;  %v1278_v33 = vld [vmem:[#allocation10 + $0x88] sm:$0xff] }
  0xa3   :  { %1640 = vmatprep.subr.bf16.mxu0 %v1920_v37 }
  0xa6   :  { %1641 = vmatpush3.bf16.msra.mxu0 %v1920_v37 }
 0x15f   :  { %v2260_v43 = vpop.f32.mrb[0].mxu0 }
 0x160   :  { %v257_v44 = vpop.f32.mrb[1].mxu0  ;;  %v281_v46 = vmul.f32 %v2260_v43, %v2260_v43 }
 0x161   :  { %v2262_v45 = vpop.f32.mrb[2].mxu0  ;;  %v1923_v44 = vld [vmem:[#allocation7 + $0xb8] sm:$0xff]  }
 0x162   :  { %v272_v47 = vadd.f32 %v2262_v45, %v2260_v43  ;;  %v282_v48 = vmul.f32 %v2262_v45, %v2262_v45  ;;  %v260_v49 = vpop.f32.mrb[3].mxu0  ;;  %1642 = vmatprep.subr.bf16.mxu0 %v1923_v44 }
 0x163   :  { %1643 = vmatpush3.bf16.msra.mxu0 %v1923_v44 }
 0x164   :  { %v285_v50 = vadd.f32 %v282_v48, %v281_v46 }
 0x167   :  { %v2270_v51 = vpop.f32.mrb[4].mxu0 }
 0x168   :  { %v273_v52 = vadd.f32 %v272_v47, %v2270_v51  ;;  %v283_v53 = vmul.f32 %v2270_v51, %v2270_v51  ;;  %v265_v54 = vpop.f32.mrb[5].mxu0 }
 0x169   :  { %v2275_v55 = vpop.f32.mrb[6].mxu0 }
 0x16a   :  { %v286_v56 = vadd.f32 %v285_v50, %v283_v53  ;;  %v274_v57 = vadd.f32 %v273_v52, %v2275_v55  ;;  %v284_v58 = vmul.f32 %v2275_v55, %v2275_v55  ;;  %v268_v59 = vpop.f32.mrb[7].mxu0  ;;  %v395_v53 = vlaneseq }
 0x16c   :  { %v275_v60 = vrot.slane %v274_v57, 4  ;;  %v287_v61 = vadd.f32 %v286_v56, %v284_v58  ;;  %v2282_v54 = vshrl.u32 %v395_v53, 7 }
 0x16e   :  { %v276_v62 = vadd.f32 %v275_v60, %v274_v57  ;;  %v288_v63 = vrot.slane %v287_v61, 4  ;;  %v270_v57 = vld [vmem:[%s2457_s3] sm:$0x1]  ;;  %v2288_v59 = vsub.s32 0, %v2282_v54  ;;  %vm476_vm3 = vcmp.lt.s32.totalorder %v2282_v54, 1 }
 0x16f   :  { %vm495_vm4 = vcmp.lt.s32.totalorder %v2282_v54, 7 }
 0x170   :  { %v277_v0 = vrot.slane %v276_v62, 2  ;;  %v289_v2 = vadd.f32 %v288_v63, %v287_v61  ;;  %v271_v61 = vld [vmem:[%s2457_s3 + $0x1] sm:$0x1] }
 0x172   :  { %v278_v3 = vadd.f32 %v277_v0, %v276_v62  ;;  %v290_v4 = vrot.slane %v289_v2, 2  ;;  %v417_v0 = vadd.s32 8, %v2282_v54 }
 0x174   :  { %v279_v5 = vrot.slane %v278_v3, 1  ;;  %v291_v6 = vadd.f32 %v290_v4, %v289_v2  ;;  %v419_v2 = vadd.s32 24, %v2282_v54 }
 0x176   :  { %v292_v7 = vrot.slane %v291_v6, 1  ;;  %v280_v8 = vadd.f32 %v279_v5, %v278_v3  ;;  %v445_v12 = vand.u32 15, %v419_v2 }
 0x178   :  { %v293_v9 = vadd.f32 %v292_v7, %v291_v6  ;;  %vm2309_vm7 = vcmp.ne.s32.totalorder %v445_v12, 15 }
 0x179   :  { %vm1462_vm11 = vmpackc.low %vm2309_vm7, %vm2105_vm8 }
 0x17a   :  { %v295_v10 = vsel %vm294_vm2, %v280_v8, %v293_v9  ;;  %v424_v9 = vand.u32 15, %v2282_v54 }
 0x17b   :  { %1626 = vmatmul.mubr.f32.vlgmr.msra.gmra.mrb[0].mxu1 %v295_v10  ;;  %v431_v10 = vand.u32 15, %v417_v0 }
 0x17c   :  { %1503 = vmatpush3.bf16.msra.mxu1 %v1901_v13  ;;  %vm1481_vm5 = vcmp.ne.s32.totalorder %v424_v9, 0 }
 0x17d   :  { %1504 = vmatprep.subr.bf16.mxu1 %v1903_v15  ;;  %vm2305_vm6 = vcmp.ne.s32.totalorder %v431_v10, 15  ;;  %vm2316_vm9 = vmpackc.low %vm2105_vm8, %vm1481_vm5 }
 0x17e   :  { %vm1458_vm10 = vmpackc.low %vm2305_vm6, %vm2105_vm8 }
 0x180   :  { %1505 = vmatpush3.bf16.msra.mxu1 %v1904_v16 }
 0x181   :  { %1506 = vmatprep.subr.bf16.mxu1 %v1906_v18 }
 0x184   :  { %1507 = vmatpush3.bf16.msra.mxu1 %v1907_v19 }
 0x185   :  { %1508 = vmatprep.subr.bf16.mxu1 %v1909_v21 }
 0x188   :  { %1509 = vmatpush3.bf16.msra.mxu1 %v1910_v22 }
 0x189   :  { %1510 = vmatprep.subr.bf16.mxu1 %v1912_v25 }
 0x18c   :  { %1511 = vmatpush3.bf16.msra.mxu1 %v1913_v27 }
 0x18d   :  { %1512 = vmatprep.subr.bf16.mxu1 %v1915_v30 }
 0x190   :  { %1513 = vmatpush3.bf16.msra.mxu1 %v1916_v31 }
 0x191   :  { %1514 = vmatprep.subr.bf16.mxu1 %v1918_v34 }
 0x194   :  { %1515 = vmatpush3.bf16.msra.mxu1 %v1919_v36 }
 0x195   :  { %1516 = vmatprep.subr.bf16.mxu1 %v1921_v39 }
 0x198   :  { %1517 = vmatpush3.bf16.msra.mxu1 %v1922_v40 }
 0x199   :  { %1777 = vmatprep.subr.bf16.mxu1 %v2102_v1 }
 0x24e   :  { %v378_v46 = vpop.f32.mrb[0].mxu1 }
 0x24f   :  { %v382_v47 = vmul.f32 %v378_v46, %v378_v46  ;;  %v1627_v48 = vpop.f32.mrb[1].mxu1 }
 0x251   :  { %v384_v49 = vrot.slane %v382_v47, 7 }
 0x253   :  { %v386_v50 = vsub.f32 %v378_v46, %v384_v49 }
 0x255   :  { %v387_v52 = vadd.f32 1e-05, %v386_v50 }
 0x257   :  { %1924 = vrsqrt.f32 %v387_v52 }
 0x261   :  { %v1925_v56 = vpop.eup %1924 }
 0x262   :  { %v390_v58 = vrot.slane %v1925_v56, 1 }
 0x264   :  { %v392_v60 = vmul.f32 %v390_v58, %v270_v57 }
 0x266   :  { %v393_v62 = vmul.f32 %v392_v60, %v378_v46  ;;  %v398_v63 = vrot.slane %v392_v60, %v2288_v59 }
 0x268   :  { %v394_v3 = vsub.f32 %v271_v61, %v393_v62  ;;  %v401_v4 = vmul.f32 %v398_v63, %v2270_v51  ;;  %v402_v5 = vmul.f32 %v398_v63, %v2275_v55  ;;  %v399_v6 = vmul.f32 %v398_v63, %v2260_v43 }
 0x269   :  { %v400_v7 = vmul.f32 %v398_v63, %v2262_v45  ;;  %v418_v51 = vadd.s32 16, %v2282_v54 }
 0x26a   :  { %v406_v8 = vrot.slane %v394_v3, %v2288_v59 }
 0x26b   :  { %v438_v36 = vand.u32 15, %v418_v51 }
 0x26c   :  { %v409_v13 = vadd.f32 %v406_v8, %v401_v4  ;;  %v410_v14 = vadd.f32 %v406_v8, %v402_v5  ;;  %v407_v15 = vadd.f32 %v406_v8, %v399_v6  ;;  %v408_v16 = vadd.f32 %v406_v8, %v400_v7 }
 0x26d   :  { %vm1482_vm12 = vcmp.ne.s32.totalorder %v438_v36, 0  ;;  %v1084_v36 = vld [vmem:[#allocation10 + $0x10] sm:$0xff] }
 0x26e   :  { %v413_v55 = vmax.f32 %v409_v13, 0.0  ;;  %v414_v43 = vmax.f32 %v410_v14, 0.0  ;;  %v411_v17 = vmax.f32 %v407_v15, 0.0  ;;  %v412_v45 = vmax.f32 %v408_v16, 0.0  ;;  %vm1454_vm13 = vmpackc.low %vm2105_vm8, %vm1482_vm12 }
 0x270   :  { %v494_v20 = vrot.slane %v414_v43, 1  ;;  %v472_v21 = vrot.slane %v411_v17, 7  ;;  %v473_v22 = vrot.slane %v412_v45, 7  ;;  %v506_v24 = vpack.c.bf16 %v412_v45, %v411_v17 }
 0x271   :  { %v475_v25 = vrot.slane %v414_v43, 7  ;;  %v491_v27 = vrot.slane %v411_v17, 1  ;;  %v492_v28 = vrot.slane %v412_v45, 1  ;;  %v493_v30 = vrot.slane %v413_v55, 1 }
 0x272   :  { %732 = vmatprep.mubr.bf16.mxu1 %v506_v24  ;;  %v479_v31 = vsel %vm476_vm3, %v472_v21, %v473_v22  ;;  %v507_v34 = vpack.c.bf16 %v414_v43, %v413_v55  ;;  %v474_v37 = vrot.slane %v413_v55, 7 }
 0x273   :  { %v480_v39 = vsel %vm476_vm3, %v475_v25, %v472_v21  ;;  %v496_v40 = vsel %vm495_vm4, %v493_v30, %v494_v20  ;;  %v497_v44 = vsel %vm495_vm4, %v492_v28, %v493_v30  ;;  %v498_v46 = vsel %vm495_vm4, %v491_v27, %v492_v28  ;;  %v1083_v28 = vld [vmem:[#allocation10 + $0x8] sm:$0xff]  ;;  %v1277_v30 = vld [vmem:[#allocation10 + $0x80] sm:$0xff] }
 0x274   :  { %v1451_v47 = vpack.c.bf16 %v479_v31, %v480_v39  ;;  %v499_v48 = vsel %vm495_vm4, %v494_v20, %v491_v27  ;;  %v1459_v49 = vpack.c.bf16 %v497_v44, %v498_v46  ;;  %v477_v50 = vsel %vm476_vm3, %v474_v37, %v475_v25  ;;  %v1082_v27 = vld [vmem:[#allocation10] sm:$0xff]  ;;  %v1279_v39 = vld [vmem:[#allocation10 + $0x90] sm:$0xff]  ;;  %v1280_v44 = vld [vmem:[#allocation10 + $0x98] sm:$0xff] }
 0x275   :  { %v1463_v52 = vpack.c.bf16 %v499_v48, %v496_v40  ;;  %v478_v53 = vsel %vm476_vm3, %v473_v22, %v474_v37  ;;  %v1801_v31 = vpack.c.bf16 %v1083_v28, %v1082_v27  ;;  %v1085_v37 = vld [vmem:[#allocation10 + $0x18] sm:$0xff]  ;;  %v1837_v46 = vpack.c.bf16 %v1280_v44, %v1279_v39  ;;  %v1087_v48 = vld [vmem:[#allocation10 + $0x28] sm:$0xff] }
 0x276   :  { %1452 = vmatmul.mubr.msk.bf16.vlgmr.msra.gmra.mrb[4].mxu1 %vm2316_vm9, %v1451_v47  ;;  %1644 = vmatprep.mubr.msk.bf16.mxu0 %vm1458_vm10, %v1459_v49  ;;  %v1455_v56 = vpack.c.bf16 %v477_v50, %v478_v53  ;;  %v1805_v40 = vpack.c.bf16 %v1085_v37, %v1084_v36  ;;  %v1086_v47 = vld [vmem:[#allocation10 + $0x20] sm:$0xff]  ;;  %vm1188_vm3 = vcmask 1046534   ;;  %vm1190_vm4 = vcmask 1047559  }
 0x277   :  { %740 = vmatprep.mubr.bf16.mxu1 %v507_v34  ;;  %1645 = vmatmul.mubr.msk.bf16.vlgmr.msra.gmra.mrb[8].mxu0 %vm1462_vm11, %v1463_v52  ;;  %v1833_v34 = vpack.c.bf16 %v1278_v33, %v1277_v30  ;;  %v1281_v49 = vld [vmem:[#allocation10 + $0xa0] sm:$0xff]  ;;  %v1809_v50 = vpack.c.bf16 %v1087_v48, %v1086_v47  ;;  %v1282_v52 = vld [vmem:[#allocation10 + $0xa8] sm:$0xff] }
 0x278   :  { %1779 = vmatpush3.bf16.msra.mxu1 %v2226_v11  ;;  %1802 = vmatprep.subr.bf16.mxu0 %v1801_v31  ;;  %v1841_v53 = vpack.c.bf16 %v1282_v52, %v1281_v49  ;;  %v799_v30 = vld [vmem:[%s2457_s3 + $0x3] sm:$0x1] }
 0x279   :  { %1780 = vmatprep.subr.bf16.mxu1 %v2102_v1  ;;  %1804 = vmatpush3.bf16.msra.mxu0 %v1801_v31 }
 0x27a   :  { %1806 = vmatprep.subr.bf16.mxu0 %v1805_v40 }
 0x27c   :  { %1782 = vmatpush3.bf16.msra.mxu1 %v2231_v23 }
 0x27d   :  { %1783 = vmatprep.subr.bf16.mxu1 %v2102_v1  ;;  %1808 = vmatpush3.bf16.msra.mxu0 %v1805_v40 }
 0x27e   :  { %1456 = vmatmul.mubr.msk.bf16.gmra.mrb[8].mxu1 %vm1454_vm13, %v1455_v56  ;;  %1810 = vmatprep.subr.bf16.mxu0 %v1809_v50  ;;  %v1088_v56 = vld [vmem:[#allocation10 + $0x30] sm:$0xff] }
 0x27f   :  { %1680 = vmatprep.mubr.msk.f32.mxu1 %vm2103_vm1, %v2104_v41  ;;  %vm1184_vm1 = vcmask 1044484  }
 0x280   :  { %1785 = vmatpush3.bf16.msra.mxu1 %v2235_v26 }
 0x281   :  { %1786 = vmatprep.subr.bf16.mxu1 %v2102_v1  ;;  %1812 = vmatpush3.bf16.msra.mxu0 %v1809_v50 }
 0x284   :  { %1788 = vmatpush3.bf16.msra.mxu1 %v2239_v29 }
 0x285   :  { %1789 = vmatprep.subr.bf16.mxu1 %v2102_v1 }
 0x288   :  { %1791 = vmatpush3.bf16.msra.mxu1 %v2243_v32 }
 0x289   :  { %1792 = vmatprep.subr.bf16.mxu1 %v2102_v1 }
 0x28c   :  { %1794 = vmatpush3.bf16.msra.mxu1 %v2247_v35 }
 0x28d   :  { %1795 = vmatprep.subr.bf16.mxu1 %v2102_v1 }
 0x290   :  { %1797 = vmatpush3.bf16.msra.mxu1 %v2251_v38 }
 0x291   :  { %1798 = vmatprep.subr.bf16.mxu1 %v2102_v1 }
 0x294   :  { %1800 = vmatpush3.bf16.msra.mxu1 %v2256_v42 }
 0x295   :  { %1834 = vmatprep.subr.bf16.mxu1 %v1833_v34 }
 0x349   :  { %v1518_v11 = vpop.f32.mrb[4].mxu1 }
 0x34a   :  { %v1519_v23 = vpop.f32.mrb[5].mxu1  ;;  %v1646_v26 = vpop.f32.mrb[8].mxu0 }
 0x34b   :  { %v1520_v29 = vadd.f32 %v1519_v23, %v1518_v11  ;;  %v1521_v41 = vpop.f32.mrb[6].mxu1  ;;  %v783_v57 = vpop.f32.mrb[9].mxu0  ;;  %v1089_v11 = vld [vmem:[#allocation10 + $0x38] sm:$0xff]  ;;  %v1283_v23 = vld [vmem:[#allocation10 + $0xb0] sm:$0xff] }
 0x34c   :  { %v1522_v58 = vpop.f32.mrb[7].mxu1  ;;  %v1647_v32 = vpop.f32.mrb[10].mxu0 }
 0x34d   :  { %v2360_v60 = vadd.f32 %v1520_v29, %v783_v57  ;;  %v1523_v61 = vadd.f32 %v1522_v58, %v1521_v41  ;;  %v786_v35 = vpop.f32.mrb[11].mxu0  ;;  %v1284_v29 = vld [vmem:[#allocation10 + $0xb8] sm:$0xff]  ;;  %v1090_v57 = vld [vmem:[#allocation10 + $0x40] sm:$0xff]  ;;  %v1091_v58 = vld [vmem:[#allocation10 + $0x48] sm:$0xff] }
 0x34e   :  { %v1845_v41 = vpack.c.bf16 %v1284_v29, %v1283_v23 }
 0x34f   :  { %v2362_v62 = vadd.f32 %v1523_v61, %v786_v35  ;;  %v809_v3 = vmul.f32 %v2360_v60, %v2360_v60  ;;  %v1817_v61 = vpack.c.bf16 %v1091_v58, %v1090_v57  ;;  %v1286_v35 = vld [vmem:[#allocation10 + $0xc8] sm:$0xff] }
 0x351   :  { %v1524_v63 = vpop.f32.mrb[8].mxu1  ;;  %v810_v1 = vmul.f32 %v2362_v62, %v2362_v62  ;;  %v800_v4 = vadd.f32 %v2362_v62, %v2360_v60 }
 0x352   :  { %v1525_v38 = vpop.f32.mrb[9].mxu1 }
 0x353   :  { %v1526_v42 = vadd.f32 %v1525_v38, %v1524_v63  ;;  %v1527_v0 = vpop.f32.mrb[10].mxu1  ;;  %v813_v7 = vadd.f32 %v810_v1, %v809_v3  ;;  %v1092_v63 = vld [vmem:[#allocation10 + $0x50] sm:$0xff]  ;;  %v1093_v38 = vld [vmem:[#allocation10 + $0x58] sm:$0xff]  ;;  %v1094_v3 = vld [vmem:[#allocation10 + $0x60] sm:$0xff] }
 0x354   :  { %v1528_v2 = vpop.f32.mrb[11].mxu1 }
 0x355   :  { %v2370_v5 = vadd.f32 %v1646_v26, %v1526_v42  ;;  %v1529_v6 = vadd.f32 %v1528_v2, %v1527_v0  ;;  %v1813_v26 = vpack.c.bf16 %v1089_v11, %v1088_v56  ;;  %v1821_v42 = vpack.c.bf16 %v1093_v38, %v1092_v63  ;;  %v1287_v0 = vld [vmem:[#allocation10 + $0xd0] sm:$0xff]  ;;  %v1288_v2 = vld [vmem:[#allocation10 + $0xd8] sm:$0xff] }
 0x357   :  { %v801_v8 = vadd.f32 %v800_v4, %v2370_v5  ;;  %v811_v9 = vmul.f32 %v2370_v5, %v2370_v5  ;;  %v2375_v10 = vadd.f32 %v1647_v32, %v1529_v6  ;;  %1814 = vmatprep.subr.bf16.mxu0 %v1813_v26  ;;  %v1285_v32 = vld [vmem:[#allocation10 + $0xc0] sm:$0xff]  ;;  %v1853_v4 = vpack.c.bf16 %v1288_v2, %v1287_v0  ;;  %v1095_v6 = vld [vmem:[#allocation10 + $0x68] sm:$0xff] }
 0x358   :  { %1816 = vmatpush3.bf16.msra.mxu0 %v1813_v26  ;;  %v1849_v1 = vpack.c.bf16 %v1286_v35, %v1285_v32 }
 0x359   :  { %v814_v12 = vadd.f32 %v813_v7, %v811_v9  ;;  %v802_v13 = vadd.f32 %v801_v8, %v2375_v10  ;;  %v812_v14 = vmul.f32 %v2375_v10, %v2375_v10  ;;  %1818 = vmatprep.subr.bf16.mxu0 %v1817_v61  ;;  %v1289_v7 = vld [vmem:[#allocation10 + $0xe0] sm:$0xff]  ;;  %v1290_v8 = vld [vmem:[#allocation10 + $0xe8] sm:$0xff]  ;;  %v1825_v9 = vpack.c.bf16 %v1095_v6, %v1094_v3 }
 0x35b   :  { %v803_v15 = vrot.slane %v802_v13, 4  ;;  %v815_v16 = vadd.f32 %v814_v12, %v812_v14  ;;  %v1857_v12 = vpack.c.bf16 %v1290_v8, %v1289_v7  ;;  %v1097_v14 = vld [vmem:[#allocation10 + $0x78] sm:$0xff] }
 0x35c   :  { %1820 = vmatpush3.bf16.msra.mxu0 %v1817_v61 }
 0x35d   :  { %v804_v51 = vadd.f32 %v803_v15, %v802_v13  ;;  %v816_v55 = vrot.slane %v815_v16, 4  ;;  %1822 = vmatprep.subr.bf16.mxu0 %v1821_v42  ;;  %v1096_v13 = vld [vmem:[#allocation10 + $0x70] sm:$0xff] }
 0x35e   :  { %v1291_v15 = vld [vmem:[#allocation10 + $0xf0] sm:$0xff] }
 0x35f   :  { %v805_v43 = vrot.slane %v804_v51, 2  ;;  %v817_v17 = vadd.f32 %v816_v55, %v815_v16  ;;  %v1292_v16 = vld [vmem:[#allocation10 + $0xf8] sm:$0xff] }
 0x360   :  { %1824 = vmatpush3.bf16.msra.mxu0 %v1821_v42  ;;  %v1861_v55 = vpack.c.bf16 %v1292_v16, %v1291_v15 }
 0x361   :  { %v806_v45 = vadd.f32 %v805_v43, %v804_v51  ;;  %v818_v18 = vrot.slane %v817_v17, 2  ;;  %1826 = vmatprep.subr.bf16.mxu0 %v1825_v9  ;;  %v1829_v51 = vpack.c.bf16 %v1097_v14, %v1096_v13 }
 0x363   :  { %v807_v19 = vrot.slane %v806_v45, 1  ;;  %v819_v20 = vadd.f32 %v818_v18, %v817_v17 }
 0x364   :  { %1828 = vmatpush3.bf16.msra.mxu0 %v1825_v9 }
 0x365   :  { %v820_v21 = vrot.slane %v819_v20, 1  ;;  %v808_v22 = vadd.f32 %v807_v19, %v806_v45  ;;  %1830 = vmatprep.subr.bf16.mxu0 %v1829_v51 }
 0x367   :  { %v821_v24 = vadd.f32 %v820_v21, %v819_v20 }
 0x368   :  { %1832 = vmatpush3.bf16.msra.mxu0 %v1829_v51 }
 0x369   :  { %v822_v25 = vsel %vm294_vm2, %v808_v22, %v821_v24  ;;  %v798_v22 = vld [vmem:[%s2457_s3 + $0x2] sm:$0x1]  ;;  %vm1186_vm2 = vcmask 1045509   ;;  %s2107_s3 = smov [#allocation11]  }
 0x36a   :  { %1681 = vmatmul.mubr.f32.vlgmr.msra.gmra.mrb[2].mxu1 %v822_v25  ;;  %v2106_v25 = vmov 1983009808   ;;  %s1377_s26 = sshll.u32 %s2107_s3, 4  ;;  %s1378_s26 = int_to_ptr.vmem [resolvable:$true] %s1377_s26 }
 0x36b   :  { %1836 = vmatpush3.bf16.msra.mxu1 %v1833_v34  ;;  %v936_v27 = vunpack.c.l.s4 %v2106_v25  ;;  %s2038_s1 = scalar_lea.vmem %s1378_s26, 512  ;;  %p2043_p13 = scmp.lt.s32.totalorder %s1378_s26, %s1378_s26 }
 0x36c   :  { %1838 = vmatprep.subr.bf16.mxu1 %v1837_v46  ;;  %p2039_p12 = scmp.ne.s32.totalorder %s1378_s26, %s2038_s1  ;;  %p2044_p0 = scmp.lt.s32.totalorder %s2038_s1, %s2038_s1 }
 0x36d   :  { %v937_v34 = vunpack.c.0.s8 %v936_v27 }
 0x36e   :  { %p2045_p1 = por %p2044_p0, %p2043_p13 }
 0x36f   :  { %1840 = vmatpush3.bf16.msra.mxu1 %v1837_v46  ;;  %v940_v47 = vsub.s32 %v937_v34, %v2282_v54 }
 0x370   :  { %1842 = vmatprep.subr.bf16.mxu1 %v1841_v53  ;;  %p2046_p2 = pnand %p2045_p1, %p2039_p12 }
 0x373   :  { %1844 = vmatpush3.bf16.msra.mxu1 %v1841_v53 }
 0x374   :  { %1846 = vmatprep.subr.bf16.mxu1 %v1845_v41 }
 0x377   :  { %1848 = vmatpush3.bf16.msra.mxu1 %v1845_v41 }
 0x378   :  { %1850 = vmatprep.subr.bf16.mxu1 %v1849_v1 }
 0x37b   :  { %1852 = vmatpush3.bf16.msra.mxu1 %v1849_v1 }
 0x37c   :  { %1854 = vmatprep.subr.bf16.mxu1 %v1853_v4 }
 0x37f   :  { %1856 = vmatpush3.bf16.msra.mxu1 %v1853_v4 }
 0x380   :  { %1858 = vmatprep.subr.bf16.mxu1 %v1857_v12 }
 0x383   :  { %1860 = vmatpush3.bf16.msra.mxu1 %v1857_v12 }
 0x384   :  { %1862 = vmatprep.subr.bf16.mxu1 %v1861_v55 }
 0x387   :  { %1864 = vmatpush3.bf16.msra.mxu1 %v1861_v55 }
 0x43d   :  { %v889_v43 = vpop.f32.mrb[2].mxu1 }
 0x43e   :  { %v893_v17 = vmul.f32 %v889_v43, %v889_v43  ;;  %v1682_v45 = vpop.f32.mrb[3].mxu1 }
 0x440   :  { %v895_v18 = vrot.slane %v893_v17, 7 }
 0x442   :  { %v897_v19 = vsub.f32 %v889_v43, %v895_v18 }
 0x444   :  { %v898_v20 = vadd.f32 1e-05, %v897_v19 }
 0x446   :  { %1926 = vrsqrt.f32 %v898_v20 }
 0x450   :  { %v1927_v21 = vpop.eup %1926 }
 0x451   :  { %v901_v24 = vrot.slane %v1927_v21, 1 }
 0x453   :  { %v903_v28 = vmul.f32 %v901_v24, %v798_v22 }
 0x455   :  { %v904_v31 = vmul.f32 %v903_v28, %v889_v43  ;;  %v909_v33 = vrot.slane %v903_v28, %v2288_v59 }
 0x457   :  { %v905_v36 = vsub.f32 %v799_v30, %v904_v31  ;;  %v910_v37 = vmul.f32 %v909_v33, %v2360_v60  ;;  %v911_v39 = vmul.f32 %v909_v33, %v2362_v62  ;;  %v912_v40 = vmul.f32 %v909_v33, %v2370_v5 }
 0x458   :  { %v913_v44 = vmul.f32 %v909_v33, %v2375_v10 }
 0x459   :  { %v917_v46 = vrot.slane %v905_v36, %v2288_v59 }
 0x45b   :  { %v918_v48 = vadd.f32 %v917_v46, %v910_v37  ;;  %v919_v49 = vadd.f32 %v917_v46, %v911_v39  ;;  %v920_v50 = vadd.f32 %v917_v46, %v912_v40  ;;  %v921_v52 = vadd.f32 %v917_v46, %v913_v44 }
 0x45d   :  { %v922_v53 = vmax.f32 %v918_v48, 0.0  ;;  %v923_v56 = vmax.f32 %v919_v49, 0.0  ;;  %v924_v11 = vmax.f32 %v920_v50, 0.0  ;;  %v925_v23 = vmax.f32 %v921_v52, 0.0 }
 0x45f   :  { %v934_v26 = vcombine.high %v922_v53, %v922_v53  ;;  %v941_v60 = vrot.slane %v922_v53, %v940_v47  ;;  %v968_v29 = vcombine.high %v924_v11, %v924_v11  ;;  %v975_v62 = vrot.slane %v924_v11, %v940_v47  ;;  %926 = vst [vmem:[#allocation11] sm:$0xff] %v922_v53 }
 0x460   :  { %927 = vst [vmem:[#allocation11 + $0x8] sm:$0xff] %v923_v56  ;;  %928 = vst [vmem:[#allocation11 + $0x10] sm:$0xff] %v924_v11  ;;  %v951_v5 = vcombine.high %v923_v56, %v923_v56  ;;  %v958_v10 = vrot.slane %v923_v56, %v940_v47  ;;  %v992_v57 = vrot.slane %v925_v23, %v940_v47 }
 0x461   :  { %929 = vst [vmem:[#allocation11 + $0x18] sm:$0xff] %v925_v23  ;;  %v948_v54 = vrot.slane %v934_v26, %v940_v47  ;;  %v982_v41 = vrot.slane %v968_v29, %v940_v47  ;;  %v985_v58 = vcombine.high %v925_v23, %v925_v23  ;;  %v949_v32 = vcombine.high %v941_v60, %v941_v60 }
 0x462   :  { %v965_v61 = vrot.slane %v951_v5, %v940_v47  ;;  %v966_v35 = vcombine.high %v958_v10, %v958_v10  ;;  %v1465_v63 = vrot.slane %v941_v60, 9  ;;  %v983_v38 = vcombine.high %v975_v62, %v975_v62 }
 0x463   :  { %v950_v1 = vcombine.high %v948_v54, %v948_v54  ;;  %v1467_v42 = vrot.slane %v948_v54, 9  ;;  %v1469_v0 = vrot.slane %v958_v10, 9  ;;  %v1466_v3 = vrot.slane %v949_v32, 9 }
 0x464   :  { %v967_v2 = vcombine.high %v965_v61, %v965_v61  ;;  %v1470_v4 = vrot.slane %v966_v35, 9  ;;  %v1471_v6 = vrot.slane %v965_v61, 9  ;;  %v1066_v8 = vmax.f32 %v941_v60, %v1465_v63 }
 0x465   :  { %v1468_v7 = vrot.slane %v950_v1, 9  ;;  %v1068_v9 = vmax.f32 %v948_v54, %v1467_v42  ;;  %v1070_v12 = vmax.f32 %v958_v10, %v1469_v0  ;;  %v1067_v14 = vmax.f32 %v949_v32, %v1466_v3 }
 0x466   :  { %v1472_v13 = vrot.slane %v967_v2, 9  ;;  %v1071_v15 = vmax.f32 %v966_v35, %v1470_v4  ;;  %v984_v16 = vcombine.high %v982_v41, %v982_v41  ;;  %v1473_v51 = vrot.slane %v975_v62, 9 }
 0x467   :  { %v1069_v55 = vmax.f32 %v950_v1, %v1468_v7  ;;  %v1072_v43 = vmax.f32 %v965_v61, %v1471_v6  ;;  %v1125_v17 = vrot.slane %v1068_v9, %v2288_v59  ;;  %v1117_v18 = vrot.slane %v1066_v8, %v2288_v59 }
 0x468   :  { %v1073_v45 = vmax.f32 %v967_v2, %v1472_v13  ;;  %v1121_v19 = vrot.slane %v1067_v14, %v2288_v59  ;;  %v1133_v20 = vrot.slane %v1070_v12, %v2288_v59  ;;  %v999_v22 = vrot.slane %v985_v58, %v940_v47 }
 0x469   :  { %v1129_v21 = vrot.slane %v1069_v55, %v2288_v59  ;;  %v1000_v24 = vcombine.high %v992_v57, %v992_v57  ;;  %v1474_v25 = vrot.slane %v983_v38, 9  ;;  %v1137_v27 = vrot.slane %v1071_v15, %v2288_v59 }
 0x46a   :  { %v1179_v28 = vsel %vm1178_vm14, %v1121_v19, %v1117_v18  ;;  %v1475_v30 = vrot.slane %v982_v41, 9  ;;  %v1476_v31 = vrot.slane %v984_v16, 9  ;;  %v1001_v34 = vcombine.high %v999_v22, %v999_v22 }
 0x46b   :  { %v1181_v33 = vsel %vm1180_vm15, %v1125_v17, %v1179_v28  ;;  %v1477_v36 = vrot.slane %v992_v57, 9  ;;  %v1478_v37 = vrot.slane %v1000_v24, 9  ;;  %v1141_v39 = vrot.slane %v1072_v43, %v2288_v59 }
 0x46c   :  { %v1183_v40 = vsel %vm1182_vm0, %v1129_v21, %v1181_v33  ;;  %v1074_v44 = vmax.f32 %v975_v62, %v1473_v51  ;;  %v1075_v46 = vmax.f32 %v983_v38, %v1474_v25  ;;  %v1479_v48 = vrot.slane %v999_v22, 9 }
 0x46d   :  { %v1185_v47 = vsel %vm1184_vm1, %v1133_v20, %v1183_v40  ;;  %v1076_v49 = vmax.f32 %v982_v41, %v1475_v30  ;;  %v1077_v50 = vmax.f32 %v984_v16, %v1476_v31  ;;  %v1145_v52 = vrot.slane %v1073_v45, %v2288_v59 }
 0x46e   :  { %v1187_v53 = vsel %vm1186_vm2, %v1137_v27, %v1185_v47  ;;  %v1480_v56 = vrot.slane %v1001_v34, 9  ;;  %v1078_v23 = vmax.f32 %v992_v57, %v1477_v36  ;;  %v1079_v26 = vmax.f32 %v1000_v24, %v1478_v37 }
 0x46f   :  { %v1189_v11 = vsel %vm1188_vm3, %v1141_v39, %v1187_v53  ;;  %v1153_v60 = vrot.slane %v1075_v46, %v2288_v59  ;;  %v1149_v62 = vrot.slane %v1074_v44, %v2288_v59  ;;  %v1157_v5 = vrot.slane %v1076_v49, %v2288_v59 }
 0x470   :  { %v1191_v29 = vsel %vm1190_vm4, %v1145_v52, %v1189_v11  ;;  %v1161_v10 = vrot.slane %v1077_v50, %v2288_v59  ;;  %v1080_v54 = vmax.f32 %v999_v22, %v1479_v48  ;;  %v1081_v41 = vmax.f32 %v1001_v34, %v1480_v56 }
 0x471   :  { %1715 = vmatprep.mubr.f32.mxu0 %v1191_v29  ;;  %1750 = vmatprep.mubr.f32.mxu1 %v1191_v29  ;;  %v1192_v58 = vsel %vm1178_vm14, %v1153_v60, %v1149_v62  ;;  %v1165_v32 = vrot.slane %v1078_v23, %v2288_v59  ;;  %v1169_v61 = vrot.slane %v1079_v26, %v2288_v59 }
 0x472   :  { %v1193_v57 = vsel %vm1180_vm15, %v1157_v5, %v1192_v58  ;;  %v1173_v63 = vrot.slane %v1080_v54, %v2288_v59  ;;  %v1177_v1 = vrot.slane %v1081_v41, %v2288_v59 }
 0x473   :  { %v1194_v35 = vsel %vm1182_vm0, %v1161_v10, %v1193_v57 }
 0x474   :  { %v1195_v38 = vsel %vm1184_vm1, %v1165_v32, %v1194_v35 }
 0x475   :  { %v1196_v42 = vsel %vm1186_vm2, %v1169_v61, %v1195_v38 }
 0x476   :  { %v1197_v0 = vsel %vm1188_vm3, %v1173_v63, %v1196_v42 }
 0x477   :  { %v1198_v2 = vsel %vm1190_vm4, %v1177_v1, %v1197_v0 }
 0x478   :  { %1716 = vmatmul.mubr.f32.vlgmr.msra.gmra.mrb[12].mxu0 %v1198_v2  ;;  %1751 = vmatmul.mubr.f32.vlgmr.msra.gmra.mrb[12].mxu1 %v1198_v2 }
 0x479   :  { %2049 = shalt.err (!%p2046_p2)
}
 0x47a   :  { %s2050_s30 = scalar_lea.hbm %s2460_s6, 512 }
 0x47b   :  { %p2051_p3 = scmp.ne.s32.totalorder %s2460_s6, %s2050_s30  ;;  %p2054_p4 = scmp.lt.u32.totalorder %s2050_s30, %s2460_s6 }
 0x47d   :  { %p2056_p5 = pnand %p2054_p4, %p2051_p3 }
 0x47f   :  { %2059 = shalt.err (!%p2056_p5)
}
 0x480   :  { %1383 = dma.vmem_to_hbm [thread:$0]  %s1378_s26, 512, %s2460_s6, [#allocation4], %s2097_s25, %s2097_s25, %s2098_s27  }
 0x481   :  { %s2108_s14 = smov [#allocation12]  }
 0x482   :  { %s1389_s15 = sshll.u32 %s2108_s14, 4  ;;  %s1390_s15 = int_to_ptr.vmem [resolvable:$true] %s1389_s15 }
 0x483   :  { %s2060_s17 = scalar_lea.vmem %s1390_s15, 256  ;;  %p2065_p7 = scmp.lt.s32.totalorder %s1390_s15, %s1390_s15 }
 0x484   :  { %p2061_p6 = scmp.ne.s32.totalorder %s1390_s15, %s2060_s17  ;;  %p2066_p8 = scmp.lt.s32.totalorder %s2060_s17, %s2060_s17 }
 0x486   :  { %p2067_p9 = por %p2066_p8, %p2065_p7 }
 0x488   :  { %p2068_p10 = pnand %p2067_p9, %p2061_p6 }
 0x54b   :  { %v1717_v59 = vpop.f32.mrb[12].mxu0  ;;  %v1752_v3 = vpop.f32.mrb[12].mxu1 }
 0x54c   :  { %v1369_v4 = vmax.f32 %v1717_v59, %v1752_v3  ;;  %v1267_v6 = vpop.f32.mrb[13].mxu0  ;;  %v1359_v7 = vpop.f32.mrb[13].mxu1 }
 0x54d   :  { %v1368_v8 = vmax.f32 %v1267_v6, %v1359_v7 }
 0x54e   :  { %1371 = vst [vmem:[#allocation12 + $0x8] sm:$0xff] %v1369_v4 }
 0x54f   :  { %1370 = vst [vmem:[#allocation12] sm:$0xff] %v1368_v8 }
 0x550   :  { %2071 = shalt.err (!%p2068_p10)
}
 0x551   :  { %s2072_s16 = scalar_lea.hbm %s2461_s7, 256 }
 0x552   :  { %p2073_p11 = scmp.ne.s32.totalorder %s2461_s7, %s2072_s16  ;;  %p2076_p12 = scmp.lt.u32.totalorder %s2072_s16, %s2461_s7 }
 0x554   :  { %p2078_p13 = pnand %p2076_p12, %p2073_p11 }
 0x556   :  { %2081 = shalt.err (!%p2078_p13)
}
 0x557   :  { %1395 = dma.vmem_to_hbm [thread:$0]  %s1390_s15, 256, %s2461_s7, [#allocation13], %s2097_s25, %s2097_s25, %s2098_s27  }
 0x558   :  { %2088 = dma.done.wait [#allocation4], 512  }
 0x559   :  { %2089 = vsyncadd [#allocation4], 4294966784 }
 0x55a   :  { %2090 = dma.done.wait [#allocation13], 256  }
 0x55b   :  { %2091 = vsyncadd [#allocation13], 4294967040 }
 0x55c   :  { %1402 = vsyncpa [#allocation3], 1 }
 0x55d   :  { %1403 = vsyncpa [#allocation6], 1 }
 0x55e   :  { %1404 = vsyncpa [#allocation9], 1 }
 0x55f   :  { %1405 = vsyncpa [#allocation4], 1 }
 0x560   :  { %1406 = vsyncpa [#allocation13], 1 }

</bundles_post_ra>
